<compile_context>
chip_gen: v7x
topology: tpu7x:2x2x1
jax: 0.10.0
libtpu: 0.0.40
codegen_flags: <defaults>
</compile_context>

<pallas_src>
import jax
import jax.numpy as jnp
from jax.experimental import pallas as pl
from jax.experimental.pallas import tpu as pltpu


def _round_up(x, m):
    return (x + m - 1) // m * m


def _sublane(dtype):
    return {4: 8, 2: 16, 1: 32}.get(jnp.dtype(dtype).itemsize, 8)


def filt_linear_kernel(xr_ref, xi_ref, wr_ref, wi_ref, y_ref):
    # One MXU dot per input: block-diagonal weights give `fold` independent
    # row-dot-products per matmul, with f32 accumulation.
    yr = jnp.dot(xr_ref[...], wr_ref[...], preferred_element_type=jnp.float32)
    yi = jnp.dot(xi_ref[...], wi_ref[...], preferred_element_type=jnp.float32)
    # Fused output block (real cols then imag cols) -> one dense store.
    y_ref[...] = jnp.concatenate([yr, yi], axis=1).astype(y_ref.dtype)


def filt_linear(x_real, x_imag, w_real, w_imag, *, tile_rows=None,
                vmem_budget_bytes=24 * 1024 * 1024):
    """Equivalent of FiltLinear.forward(x_real, x_imag) with bias=False."""
    B, F = x_real.shape
    assert x_imag.shape == (B, F)
    assert w_real.shape == (1, F) and w_imag.shape == (1, F)

    out_dtype = x_real.dtype
    itemsize = jnp.dtype(out_dtype).itemsize
    sub = _sublane(out_dtype)

    # Fold several logical rows into one 128-lane row when possible: the HBM
    # reshape is free (contiguous row-major) and makes every VMEM block and
    # DMA lane-dense instead of using F/128 of each vreg.
    fold = 128 // F if (128 % F == 0 and B % max(1, 128 // F) == 0) else 1
    R, Fw = B // fold, F * fold

    xr = x_real.reshape(R, Fw)
    xi = x_imag.reshape(R, Fw)

    # Block-diagonal weights: column j carries the filter for the j-th folded
    # row, so yr[r, j] = dot(x_real[r*fold + j], w_real).
    eye = jnp.eye(fold, dtype=w_real.dtype)
    wr = jnp.kron(eye, w_real.reshape(F, 1))      # (Fw, fold)
    wi = jnp.kron(eye, w_imag.reshape(F, 1))      # (Fw, fold)

    if tile_rows is None:
        # VMEM accounting with (8,128)-tile padding: the last dim of every
        # block pads up to 128 lanes; inputs and output are double-buffered.
        in_row = _round_up(Fw, 128) * itemsize
        out_row = _round_up(2 * fold, 128) * itemsize
        per_row = 2 * 2 * in_row + 2 * out_row
        tile_rows = vmem_budget_bytes // per_row

    tile_rows = max(sub, tile_rows // sub * sub)
    # Guarantee >=2 grid steps (when R allows) so the parallel batch axis can
    # be sharded across both TensorCores on v7x.
    if R > sub:
        tile_rows = min(tile_rows, _round_up(pl.cdiv(R, 2), sub))
    tile_rows = min(tile_rows, _round_up(R, sub))

    # No host-side padding: Pallas masks the ragged last block (reads of rows
    # past R are garbage but row-independent, and their writes are dropped).
    grid = (pl.cdiv(R, tile_rows),)

    cost = pl.CostEstimate(
        flops=4 * B * F,
        transcendentals=0,
        bytes_accessed=(2 * B * F + 2 * Fw * fold + 2 * B) * itemsize,
    )

    y = pl.pallas_call(
        filt_linear_kernel,
        out_shape=jax.ShapeDtypeStruct((R, 2 * fold), out_dtype),
        grid=grid,
        in_specs=[
            pl.BlockSpec((tile_rows, Fw), lambda i: (i, 0)),
            pl.BlockSpec((tile_rows, Fw), lambda i: (i, 0)),
            pl.BlockSpec((Fw, fold), lambda i: (0, 0)),   # weights stay resident
            pl.BlockSpec((Fw, fold), lambda i: (0, 0)),
        ],
        out_specs=pl.BlockSpec((tile_rows, 2 * fold), lambda i: (i, 0)),
        compiler_params=pltpu.CompilerParams(
            dimension_semantics=("parallel",),   # shard batch across TCs (v7x)
            vmem_limit_bytes=48 * 1024 * 1024,
        ),
        cost_estimate=cost,
    )(xr, xi, wr, wi)

    y_real = y[:, :fold].reshape(B, 1)
    y_imag = y[:, fold:].reshape(B, 1)
    return y_real, y_imag


if __name__ == "__main__":
    key = jax.random.PRNGKey(0)
    k_xr, k_xi, k_wr, k_wi = jax.random.split(key, 4)

    batch = 128
    in_features = 32

    x_real = jax.random.normal(k_xr, (batch, in_features), dtype=jnp.float32)
    x_imag = jax.random.normal(k_xi, (batch, in_features), dtype=jnp.float32)

    # Parameter shapes exactly as nn.Linear(in_features, 1, bias=False).weight
    bound = 1.0 / jnp.sqrt(jnp.float32(in_features))
    w_real = jax.random.uniform(
        k_wr, (1, in_features), dtype=jnp.float32, minval=-bound, maxval=bound
    )
    w_imag = jax.random.uniform(
        k_wi, (1, in_features), dtype=jnp.float32, minval=-bound, maxval=bound
    )

    # Main path: fold=4 (F=32 -> 128 lanes), 2-step grid.
    y_real, y_imag = filt_linear(x_real, x_imag, w_real, w_imag)
    jax.block_until_ready((y_real, y_imag))

    ref_real = x_real @ w_real.T
    ref_imag = x_imag @ w_imag.T
    assert y_real.shape == (batch, 1) and y_imag.shape == (batch, 1)
    assert jnp.allclose(y_real, ref_real, atol=1e-5, rtol=1e-5)
    assert jnp.allclose(y_imag, ref_imag, atol=1e-5, rtol=1e-5)

    # Fallback path: F does not divide 128 and B is ragged w.r.t. the tile.
    b2, f2 = 100, 48
    k_a, k_b, k_c, k_d = jax.random.split(jax.random.PRNGKey(1), 4)
    xa = jax.random.normal(k_a, (b2, f2), dtype=jnp.float32)
    xb = jax.random.normal(k_b, (b2, f2), dtype=jnp.float32)
    wa = jax.random.normal(k_c, (1, f2), dtype=jnp.float32) * 0.1
    wb = jax.random.normal(k_d, (1, f2), dtype=jnp.float32) * 0.1
    ya, yb = filt_linear(xa, xb, wa, wb)
    jax.block_until_ready((ya, yb))
    assert jnp.allclose(ya, xa @ wa.T, atol=1e-5, rtol=1e-5)
    assert jnp.allclose(yb, xb @ wb.T, atol=1e-5, rtol=1e-5)

    print("KERNEL_OK")
</pallas_src>

<mosaic_0001>
module attributes {stable_mosaic.version = 11 : i64} {
  func.func @filt_linear_kernel(%arg0: i32, %arg1: memref<16x128xf32, #tpu.memory_space<vmem>>, %arg2: memref<16x128xf32, #tpu.memory_space<vmem>>, %arg3: memref<128x4xf32, #tpu.memory_space<vmem>>, %arg4: memref<128x4xf32, #tpu.memory_space<vmem>>, %arg5: memref<16x8xf32, #tpu.memory_space<vmem>>) attributes {dimension_semantics = [#tpu.dimension_semantics<parallel>], iteration_bounds = array<i64: 2>, scalar_prefetch = 0 : i64, scratch_operands = 0 : i64, tpu.core_type = #tpu.core_type<tc>, window_params = [{transform_indices = @transform_0, window_bounds = array<i64: 16, 128>}, {transform_indices = @transform_1, window_bounds = array<i64: 16, 128>}, {pipeline_mode = #tpu.pipeline_mode<synchronous>, transform_indices = @transform_2, window_bounds = array<i64: 128, 4>}, {pipeline_mode = #tpu.pipeline_mode<synchronous>, transform_indices = @transform_3, window_bounds = array<i64: 128, 4>}, {transform_indices = @transform_4, window_bounds = array<i64: 16, 8>}]} {
    %c0 = arith.constant 0 : index
    %c0_0 = arith.constant 0 : index
    %0 = vector.load %arg1[%c0, %c0_0] : memref<16x128xf32, #tpu.memory_space<vmem>>, vector<16x128xf32>
    %c0_1 = arith.constant 0 : index
    %c0_2 = arith.constant 0 : index
    %1 = vector.load %arg3[%c0_1, %c0_2] : memref<128x4xf32, #tpu.memory_space<vmem>>, vector<128x4xf32>
    %cst = arith.constant dense<0.000000e+00> : vector<16x4xf32>
    %2 = tpu.matmul %0, %1, %cst {dimension_numbers = #tpu.dot_dimension_numbers<[1], [0], [0], [1], [0, 0, 1, 1], [], []>} : vector<16x128xf32>, vector<128x4xf32>, vector<16x4xf32> -> vector<16x4xf32>
    %c0_3 = arith.constant 0 : index
    %c0_4 = arith.constant 0 : index
    %3 = vector.load %arg2[%c0_3, %c0_4] : memref<16x128xf32, #tpu.memory_space<vmem>>, vector<16x128xf32>
    %c0_5 = arith.constant 0 : index
    %c0_6 = arith.constant 0 : index
    %4 = vector.load %arg4[%c0_5, %c0_6] : memref<128x4xf32, #tpu.memory_space<vmem>>, vector<128x4xf32>
    %cst_7 = arith.constant dense<0.000000e+00> : vector<16x4xf32>
    %5 = tpu.matmul %3, %4, %cst_7 {dimension_numbers = #tpu.dot_dimension_numbers<[1], [0], [0], [1], [0, 0, 1, 1], [], []>} : vector<16x128xf32>, vector<128x4xf32>, vector<16x4xf32> -> vector<16x4xf32>
    %6 = tpu.concatenate %2, %5 in 1 : vector<16x4xf32>, vector<16x4xf32> -> vector<16x8xf32>
    %c0_8 = arith.constant 0 : index
    %c0_9 = arith.constant 0 : index
    %7 = vector.load %arg5[%c0_8, %c0_9] : memref<16x8xf32, #tpu.memory_space<vmem>>, vector<16x8xf32>
    tpu.vector_store %arg5[%c0_8, %c0_9], %6 {strides = array<i32>} : memref<16x8xf32, #tpu.memory_space<vmem>>, vector<16x8xf32>,
    return
  }
  func.func @transform_0(%arg0: i32) -> (i32, i32) {
    %c0_i32 = arith.constant 0 : i32
    %c0_i32_0 = arith.constant 0 : i32
    return %arg0, %c0_i32 : i32, i32
  }
  func.func @transform_1(%arg0: i32) -> (i32, i32) {
    %c0_i32 = arith.constant 0 : i32
    %c0_i32_0 = arith.constant 0 : i32
    return %arg0, %c0_i32 : i32, i32
  }
  func.func @transform_2(%arg0: i32) -> (i32, i32) {
    %c0_i32 = arith.constant 0 : i32
    %c0_i32_0 = arith.constant 0 : i32
    %c0_i32_1 = arith.constant 0 : i32
    return %c0_i32, %c0_i32_0 : i32, i32
  }
  func.func @transform_3(%arg0: i32) -> (i32, i32) {
    %c0_i32 = arith.constant 0 : i32
    %c0_i32_0 = arith.constant 0 : i32
    %c0_i32_1 = arith.constant 0 : i32
    return %c0_i32, %c0_i32_0 : i32, i32
  }
  func.func @transform_4(%arg0: i32) -> (i32, i32) {
    %c0_i32 = arith.constant 0 : i32
    %c0_i32_0 = arith.constant 0 : i32
    return %arg0, %c0_i32 : i32, i32
  }
}

</mosaic_0001>

<bundles_post_ra>
// kernel: tpu_custom_call.1
= control target key start
LH: loop header
LB: loop body
LE: loop exit
PB: predicated region body
PF: predicated region fallthrough
CT: control target
= control target key end

     0   :  { %s717_s15 = smov 0   ;;  %s846_s0 = inlined_call_operand.vmem [shape: f32[32,128], index: 0, kind: input, shape index: {}]   ;;  %s847_s1 = inlined_call_operand.vmem [shape: f32[32,128], index: 1, kind: input, shape index: {}]   ;;  %s848_s2 = inlined_call_operand.vmem [shape: f32[128,4], index: 2, kind: input, shape index: {}]   ;;  %s849_s3 = inlined_call_operand.vmem [shape: f32[128,4], index: 3, kind: input, shape index: {}]   ;;  %s850_s4 = inlined_call_operand.vmem [shape: f32[32,8], index: 4, kind: output, shape index: {}]  }
   0x1 LB: > { %s491_s16 = sadd.s32 4294967295, %s689_s15   ;;  %p495_p0 = scmp.ge.s32.totalorder %s689_s15, 1  ;;  %s689_s15 = sphi %s717_s15, %s14_s15  }
   0x2   : > { %p174_p1 = scmp.lt.s32.totalorder %s689_s15, 3 }
   0x4   : > { %p175_p2 = pnand %p495_p0, %p174_p1 }
   0x5   : > { %v318_v0 = vld [vmem:[%s849_s3] sm:$0xff] (!%p175_p2)  ;;  %v319_v1 = vld [vmem:[%s849_s3 + $0x8] sm:$0xff] (!%p175_p2)  ;;  %v320_v2 = vld [vmem:[%s849_s3 + $0x10] sm:$0xff] (!%p175_p2)  ;;  %s496_s23 = sshll.u32 (!%p175_p2), %s491_s16, 1  ;;  %s691_s19 = smov (!%p175_p2), 4   ;;  %vm417_vm0 = vcmask (!%p175_p2), 31744  }
   0x6   : > { %178 = sbr.rel (%p175_p2) target bundleno = 374 (0x176), region = 36  ;;  %v642_v3 = vpack.c.bf16 (!%p175_p2), %v319_v1, %v318_v0  ;;  %v321_v4 = vld [vmem:[%s849_s3 + $0x18] sm:$0xff] (!%p175_p2)  ;;  %p206_p3 = scmp.lt.s32.totalorder (!%p175_p2), %s496_s23, 3  ;;  %v322_v6 = vld [vmem:[%s849_s3 + $0x20] sm:$0xff] (!%p175_p2)  ;;  %v323_v7 = vld [vmem:[%s849_s3 + $0x28] sm:$0xff] (!%p175_p2)  ;;  %vm420_vm1 = vcmask (!%p175_p2), 64512  }
   0x7   : > { %v646_v5 = vpack.c.bf16 (!%p175_p2), %v321_v4, %v320_v2  ;;  %v650_v8 = vpack.c.bf16 (!%p175_p2), %v323_v7, %v322_v6  ;;  %v324_v9 = vld [vmem:[%s849_s3 + $0x30] sm:$0xff] (!%p175_p2)  ;;  %v225_v10 = vld [vmem:[%s848_s2] sm:$0xff] (!%p175_p2)  ;;  %v226_v11 = vld [vmem:[%s848_s2 + $0x8] sm:$0xff] (!%p175_p2) }
   0x8   : > { %643 = vmatprep.subr.bf16.mxu1 (!%p175_p2), %v642_v3  ;;  %v325_v12 = vld [vmem:[%s849_s3 + $0x38] sm:$0xff] (!%p175_p2)  ;;  %v610_v13 = vpack.c.bf16 (!%p175_p2), %v226_v11, %v225_v10  ;;  %v227_v14 = vld [vmem:[%s848_s2 + $0x10] sm:$0xff] (!%p175_p2)  ;;  %v229_v18 = vld [vmem:[%s848_s2 + $0x20] sm:$0xff] (!%p175_p2) }
   0x9   : > { %645 = vmatpush3.bf16.msra.mxu1 (!%p175_p2), %v642_v3  ;;  %v228_v15 = vld [vmem:[%s848_s2 + $0x18] sm:$0xff] (!%p175_p2)  ;;  %v230_v19 = vld [vmem:[%s848_s2 + $0x28] sm:$0xff] (!%p175_p2)  ;;  %v654_v20 = vpack.c.bf16 (!%p175_p2), %v325_v12, %v324_v9  ;;  %v326_v21 = vld [vmem:[%s849_s3 + $0x40] sm:$0xff] (!%p175_p2) }
   0xa   : > { %647 = vmatprep.subr.bf16.mxu1 (!%p175_p2), %v646_v5  ;;  %v614_v17 = vpack.c.bf16 (!%p175_p2), %v228_v15, %v227_v14  ;;  %611 = vmatprep.subr.bf16.mxu0 (!%p175_p2), %v610_v13  ;;  %v327_v22 = vld [vmem:[%s849_s3 + $0x48] sm:$0xff] (!%p175_p2)  ;;  %v618_v23 = vpack.c.bf16 (!%p175_p2), %v230_v19, %v229_v18  ;;  %v231_v25 = vld [vmem:[%s848_s2 + $0x30] sm:$0xff] (!%p175_p2)  ;;  %v232_v26 = vld [vmem:[%s848_s2 + $0x38] sm:$0xff] (!%p175_p2) }
   0xb   : > { %613 = vmatpush3.bf16.msra.mxu0 (!%p175_p2), %v610_v13  ;;  %v658_v27 = vpack.c.bf16 (!%p175_p2), %v327_v22, %v326_v21  ;;  %v328_v28 = vld [vmem:[%s849_s3 + $0x50] sm:$0xff] (!%p175_p2)  ;;  %v329_v29 = vld [vmem:[%s849_s3 + $0x58] sm:$0xff] (!%p175_p2)  ;;  %v622_v30 = vpack.c.bf16 (!%p175_p2), %v232_v26, %v231_v25  ;;  %v233_v31 = vld [vmem:[%s848_s2 + $0x40] sm:$0xff] (!%p175_p2) }
   0xc   : > { %615 = vmatprep.subr.bf16.mxu0 (!%p175_p2), %v614_v17  ;;  %v234_v32 = vld [vmem:[%s848_s2 + $0x48] sm:$0xff] (!%p175_p2)  ;;  %v662_v33 = vpack.c.bf16 (!%p175_p2), %v329_v29, %v328_v28  ;;  %v330_v34 = vld [vmem:[%s849_s3 + $0x60] sm:$0xff] (!%p175_p2)  ;;  %v235_v37 = vld [vmem:[%s848_s2 + $0x50] sm:$0xff] (!%p175_p2) }
   0xd   : > { %s852_s23 = smov (!%p206_p3, %s496_s23), 3  ;;  %649 = vmatpush3.bf16.msra.mxu1 %v646_v5  ;;  %v331_v35 = vld [vmem:[%s849_s3 + $0x68] sm:$0xff]  ;;  %v626_v36 = vpack.c.bf16 %v234_v32, %v233_v31  ;;  %v236_v38 = vld [vmem:[%s848_s2 + $0x58] sm:$0xff]  ;;  %v332_v40 = vld [vmem:[%s849_s3 + $0x70] sm:$0xff] }
   0xe   : > { %s746_s6 = sshll.u32 %s852_s23, 3  ;;  %651 = vmatprep.subr.bf16.mxu1 %v650_v8  ;;  %v666_v39 = vpack.c.bf16 %v331_v35, %v330_v34  ;;  %v333_v41 = vld [vmem:[%s849_s3 + $0x78] sm:$0xff]  ;;  %v630_v42 = vpack.c.bf16 %v236_v38, %v235_v37  ;;  %v237_v43 = vld [vmem:[%s848_s2 + $0x60] sm:$0xff]  ;;  %v238_v44 = vld [vmem:[%s848_s2 + $0x68] sm:$0xff] }
   0xf   : > { %s761_s16 = scalar_lea.vmem %s847_s1, %s746_s6  ;;  %s780_s27 = scalar_lea.vmem %s846_s0, %s746_s6  ;;  %617 = vmatpush3.bf16.msra.mxu0 %v614_v17  ;;  %v670_v45 = vpack.c.bf16 %v333_v41, %v332_v40  ;;  %v634_v46 = vpack.c.bf16 %v238_v44, %v237_v43  ;;  %v239_v47 = vld [vmem:[%s848_s2 + $0x70] sm:$0xff]  ;;  %v240_v48 = vld [vmem:[%s848_s2 + $0x78] sm:$0xff] }
  0x10   : > { %v316_v16 = vld [vmem:[%s761_s16] sm:$0xff]  ;;  %619 = vmatprep.subr.bf16.mxu0 %v618_v23  ;;  %v638_v49 = vpack.c.bf16 %v240_v48, %v239_v47  ;;  %v317_v50 = vld [vmem:[%s761_s16 + $0x8] sm:$0xff]  ;;  %s221_s22 = scalar_lea.vmem %s850_s4, %s746_s6 }
  0x11   : > { %607 = vmatprep.mubr.f32.mxu1 %v316_v16  ;;  %v223_v24 = vld [vmem:[%s780_s27] sm:$0xff]  ;;  %653 = vmatpush3.bf16.msra.mxu1 %v650_v8  ;;  %v224_v51 = vld [vmem:[%s780_s27 + $0x8] sm:$0xff] }
  0x12   : > { %572 = vmatprep.mubr.f32.mxu0 %v223_v24  ;;  %655 = vmatprep.subr.bf16.mxu1 %v654_v20 }
  0x13   : > { %621 = vmatpush3.bf16.msra.mxu0 %v618_v23 }
  0x14   : > { %623 = vmatprep.subr.bf16.mxu0 %v622_v30 }
  0x15   : > { %657 = vmatpush3.bf16.msra.mxu1 %v654_v20 }
  0x16   : > { %659 = vmatprep.subr.bf16.mxu1 %v658_v27 }
  0x17   : > { %625 = vmatpush3.bf16.msra.mxu0 %v622_v30 }
  0x18   : > { %627 = vmatprep.subr.bf16.mxu0 %v626_v36 }
  0x19   : > { %661 = vmatpush3.bf16.msra.mxu1 %v658_v27 }
  0x1a   : > { %663 = vmatprep.subr.bf16.mxu1 %v662_v33 }
  0x1b   : > { %629 = vmatpush3.bf16.msra.mxu0 %v626_v36 }
  0x1c   : > { %631 = vmatprep.subr.bf16.mxu0 %v630_v42 }
  0x1d   : > { %665 = vmatpush3.bf16.msra.mxu1 %v662_v33 }
  0x1e   : > { %667 = vmatprep.subr.bf16.mxu1 %v666_v39 }
  0x1f   : > { %633 = vmatpush3.bf16.msra.mxu0 %v630_v42 }
  0x20   : > { %635 = vmatprep.subr.bf16.mxu0 %v634_v46 }
  0x21   : > { %669 = vmatpush3.bf16.msra.mxu1 %v666_v39 }
  0x22   : > { %671 = vmatprep.subr.bf16.mxu1 %v670_v45 }
  0x23   : > { %637 = vmatpush3.bf16.msra.mxu0 %v634_v46 }
  0x24   : > { %639 = vmatprep.subr.bf16.mxu0 %v638_v49 }
  0x25   : > { %673 = vmatpush3.bf16.msra.mxu1 %v670_v45 }
  0x27   : > { %641 = vmatpush3.bf16.msra.mxu0 %v638_v49 }
  0x28   : > { %608 = vmatmul.mubr.f32.vlgmr.msra.gmra.mrb[0].mxu1 %v317_v50 }
  0x2a   : > { %573 = vmatmul.mubr.f32.vlgmr.msra.gmra.mrb[0].mxu0 %v224_v51 }
  0xfb   : > { %v609_v52 = vpop.f32.mrb[0].mxu1 }
  0xfc   : > { %v400_v53 = vpop.f32.mrb[1].mxu1 }
  0xfd   : > { %411 = vrot.lane.b32.xlu0 %v400_v53, %s691_s19  ;;  %v574_v54 = vpop.f32.mrb[0].mxu0 }
  0xfe   : > { %v307_v55 = vpop.f32.mrb[1].mxu0 }
 0x101   : > { %413 = vrot.lane.b32.xlu0 %v609_v52, %s691_s19 }
 0x16f   : > { %v412_v56 = vpop.permute.xlu0 %411 }
 0x170   : > { %v418_v57 = vsel %vm417_vm0, %v307_v55, %v412_v56 }
 0x171   : > { %421 = vst.msk [vmem:[%s221_s22] sm:$0xff] %vm420_vm1, %v418_v57 }
 0x173   : > { %v414_v58 = vpop.permute.xlu0 %413 }
 0x174   : > { %v419_v59 = vsel %vm417_vm0, %v574_v54, %v414_v58 }
 0x175   : > { %422 = vst.msk [vmem:[%s221_s22 + $0x8] sm:$0xff] %vm420_vm1, %v419_v59 }
 0x176 PF: > { %s14_s15 = sadd.s32 1, %s689_s15  }
 0x177   : > { %p11_p4 = scmp.ge.s32.totalorder %s14_s15, 4  }
 0x179   :  { %13 = sbr.rel (!%p11_p4) target bundleno = 1 (0x1), region = 69 }

</bundles_post_ra>
